<compile_context>
chip_gen: v7x
topology: tpu7x:2x2x1
jax: 0.10.0
libtpu: 0.0.40
codegen_flags: <defaults>
</compile_context>

<pallas_src>
import functools

import jax
import jax.numpy as jnp
from jax.experimental import pallas as pl
from jax.experimental.pallas import tpu as pltpu


def _round_up(x, m):
    return ((x + m - 1) // m) * m


def _cdiv(a, b):
    return (a + b - 1) // b


def _tensorcores_per_chip():
    """Best-effort count of TensorCores per chip (2 on v7x / v4 / v5p)."""
    try:
        info = pltpu.get_tpu_info()
        for attr in ("num_cores", "cores_per_chip", "tensorcores_per_chip",
                     "num_tensorcores"):
            v = getattr(info, attr, None)
            if isinstance(v, int) and v > 0:
                return v
    except Exception:
        pass
    try:
        kind = jax.devices()[0].device_kind.lower()
        if any(t in kind for t in ("v7", "tpu7", "v4", "v5p")):
            return 2
    except Exception:
        pass
    return 1


_SB_PROBE_CACHE = {}


def _supports_single_buffered_blockspec():
    """Probe (outside jit) whether pipeline_mode=pl.Buffered(1) lowers here."""
    if "ok" in _SB_PROBE_CACHE:
        return _SB_PROBE_CACHE["ok"]
    ok = False
    if hasattr(pl, "Buffered"):
        try:
            def _probe(x_ref, o_ref):
                o_ref[...] = x_ref[...] + 1.0

            x = jnp.ones((8, 128), jnp.float32)
            y = pl.pallas_call(
                _probe,
                out_shape=jax.ShapeDtypeStruct((16, 128), jnp.float32),
                grid=(2,),
                in_specs=[pl.BlockSpec((8, 128), lambda i: (0, 0),
                                       pipeline_mode=pl.Buffered(1))],
                out_specs=pl.BlockSpec((8, 128), lambda i: (i, 0)),
            )(x)
            ok = bool(jnp.allclose(jax.block_until_ready(y), 2.0))
        except Exception:
            ok = False
    _SB_PROBE_CACHE["ok"] = ok
    return ok


def make_dqn_kernel(n_layers, out_dim):
    """Fused MLP: n_layers Linear layers with ReLU between.  Stores only the
    first `out_dim` (real) output columns to the (narrow) output ref."""

    def kernel(*refs):
        x_ref, out_ref = refs[0], refs[-1]
        h = x_ref[...]                                   # (TB, D) f32
        for li in range(n_layers):
            w_ref = refs[1 + 2 * li]
            b_ref = refs[2 + 2 * li]
            # Cast only the dot inputs to the pad-time weight dtype (bf16 by
            # default); accumulate on the MXU in f32.
            h = jnp.dot(h.astype(w_ref.dtype), w_ref[...],
                        preferred_element_type=jnp.float32)
            h = h + b_ref[...].astype(jnp.float32)       # bias add in f32
            if li < n_layers - 1:
                h = jnp.maximum(h, 0.0)                  # ReLU in f32 (v5e-safe)
        # Lane-dense compute, narrow writeback: only real Q columns hit HBM.
        out_ref[...] = h[:, :out_dim].astype(out_ref.dtype)

    return kernel


def pad_params(params, lane=128, weight_dtype=jnp.bfloat16):
    """Zero-pad feature dims (except the raw input dim) to `lane` multiples and
    cast weights ONCE to `weight_dtype` (bf16 by default: native MXU dtype,
    half the resident VMEM / DMA bytes).  Biases stay f32 (added in f32).
    Zero padding is numerically exact (padded rows/cols/biases are 0)."""
    padded = []
    for idx, (w, b) in enumerate(params):
        fin, fout = w.shape
        fin_p = fin if idx == 0 else _round_up(fin, lane)
        fout_p = _round_up(fout, lane)
        w_p = (jnp.zeros((fin_p, fout_p), jnp.float32)
               .at[:fin, :fout].set(w.astype(jnp.float32))
               .astype(weight_dtype))
        b_p = (jnp.zeros((1, fout_p), jnp.float32)
               .at[:, :fout].set(b.astype(jnp.float32)))
        padded.append((w_p, b_p))
    return padded


def dqn_forward(state, padded_params, out_dim, *, max_batch_tile=512,
                single_buffer_weights=False):
    """state: (B, input_dim+1) f32.  padded_params: list of (W, b) with
    lane-padded feature dims (W typically bf16).  Returns (B, out_dim) f32."""
    B, D = state.shape
    n_layers = len(padded_params)

    # --- Batch tiling (generation aware). --------------------------------
    n_tc = _tensorcores_per_chip()
    b_pad8 = _round_up(max(B, 8), 8)
    if b_pad8 <= max_batch_tile:
        if n_tc > 1 and b_pad8 >= 16:
            # >= 2 tiles so dimension_semantics=("parallel",) shards the batch
            # over both TensorCores (v7x / megacore).
            tb = _round_up(_cdiv(b_pad8, n_tc), 8)
        else:
            tb = b_pad8          # single TC (v5e/v6e): grid=(1,), no step overhead
    else:
        tb = max_batch_tile      # sweep 256/512/1024 for large-batch eval/training
    b_pad = _round_up(b_pad8, tb)
    if b_pad != B:
        state = jnp.pad(state, ((0, b_pad - B), (0, 0)))
    grid = (b_pad // tb,)

    # --- BlockSpecs: batch streams, weights stay VMEM-resident. ----------
    resident_kwargs = {}
    if single_buffer_weights and hasattr(pl, "Buffered"):
        # Constant index map -> no double buffering / rotation needed.
        resident_kwargs = dict(pipeline_mode=pl.Buffered(1))

    in_specs = [pl.BlockSpec((tb, D), lambda i: (i, 0))]
    flat_args = [state]
    for w, b in padded_params:
        flat_args += [w, b]
        in_specs += [pl.BlockSpec(w.shape, lambda i: (0, 0), **resident_kwargs),
                     pl.BlockSpec(b.shape, lambda i: (0, 0), **resident_kwargs)]

    # --- VMEM budget / cost estimate. -------------------------------------
    widths = [int(w.shape[1]) for w, _ in padded_params]
    param_bytes = sum(int(w.size) * w.dtype.itemsize +
                      int(b.size) * b.dtype.itemsize for w, b in padded_params)
    vmem_est = (2 * tb * D * 4                       # double-buffered input tile
                + (1 if single_buffer_weights else 2) * param_bytes
                + 2 * tb * out_dim * 4               # double-buffered output tile
                + 3 * tb * max(widths) * 4)          # live f32 activations (slack)
    compiler_kwargs = {}
    if vmem_est > 12 * 1024 * 1024:                  # above v5e default scoped VMEM
        compiler_kwargs["vmem_limit_bytes"] = min(int(vmem_est * 2),
                                                  48 * 1024 * 1024)

    flops = 2 * b_pad * sum(int(w.shape[0]) * int(w.shape[1])
                            for w, _ in padded_params)
    bytes_accessed = (param_bytes
                      + int(state.size) * state.dtype.itemsize
                      + b_pad * out_dim * 4)

    kernel = make_dqn_kernel(n_layers, out_dim)
    out = pl.pallas_call(
        kernel,
        out_shape=jax.ShapeDtypeStruct((b_pad, out_dim), jnp.float32),
        grid=grid,
        in_specs=in_specs,
        out_specs=pl.BlockSpec((tb, out_dim), lambda i: (i, 0)),
        compiler_params=pltpu.CompilerParams(
            dimension_semantics=("parallel",), **compiler_kwargs),
        cost_estimate=pl.CostEstimate(
            flops=flops, transcendentals=0, bytes_accessed=bytes_accessed),
    )(*flat_args)

    # Drop batch padding only; columns are already exact (out_dim wide).
    return out[:B]


def init_params(key, layer_dims):
    """Deterministic init mimicking nn.Linear's U(-1/sqrt(fan_in), 1/sqrt(fan_in))."""
    params = []
    for i in range(len(layer_dims) - 1):
        fan_in, fan_out = layer_dims[i], layer_dims[i + 1]
        key, kw, kb = jax.random.split(key, 3)
        bound = 1.0 / (fan_in ** 0.5)
        w = jax.random.uniform(kw, (fan_in, fan_out), jnp.float32,
                               minval=-bound, maxval=bound)
        b = jax.random.uniform(kb, (1, fan_out), jnp.float32,
                               minval=-bound, maxval=bound)
        params.append((w, b))
    return params


def reference_forward(state, params):
    h = state
    for i, (w, b) in enumerate(params):
        h = jnp.dot(h, w, precision=jax.lax.Precision.HIGHEST) + b
        if i < len(params) - 1:
            h = jnp.maximum(h, 0.0)
    return h


if __name__ == "__main__":
    # DQN(input_dim=15, output_dim=4, model_size='medium')
    input_dim_arg = 15
    eff_input_dim = input_dim_arg + 1          # module adds +1
    output_dim = 4
    hidden = [192, 48, 24]                     # 'medium'
    layer_dims = [eff_input_dim] + hidden + [output_dim]

    key = jax.random.PRNGKey(0)
    key, kx = jax.random.split(key)
    batch = 8
    state = jax.random.normal(kx, (batch, eff_input_dim), jnp.float32)

    params = init_params(key, layer_dims)
    ref = reference_forward(state, params)

    single_buf = _supports_single_buffered_blockspec()   # probed outside jit

    fwd = jax.jit(functools.partial(dqn_forward, out_dim=output_dim,
                                    single_buffer_weights=single_buf))

    # 1) f32 weights: validates padding / tiling / narrow store structurally.
    out_f32 = jax.block_until_ready(
        fwd(state, pad_params(params, weight_dtype=jnp.float32)))
    assert out_f32.shape == (batch, output_dim)
    assert jnp.allclose(out_f32, ref, atol=5e-3, rtol=5e-3), "f32 path mismatch"

    # 2) Default deployment path: bf16 weights / dot inputs, f32 accumulation.
    out_bf16 = jax.block_until_ready(fwd(state, pad_params(params)))
    assert out_bf16.shape == (batch, output_dim)
    assert jnp.allclose(out_bf16, ref, atol=5e-2, rtol=5e-2), "bf16 path mismatch"

    print("KERNEL_OK")
</pallas_src>

<mosaic_0001>
module attributes {stable_mosaic.version = 11 : i64} {
  func.func @_probe(%arg0: i32, %arg1: memref<8x128xf32, #tpu.memory_space<vmem>>, %arg2: memref<8x128xf32, #tpu.memory_space<vmem>>) attributes {dimension_semantics = [#tpu.dimension_semantics<arbitrary>], iteration_bounds = array<i64: 2>, scalar_prefetch = 0 : i64, scratch_operands = 0 : i64, tpu.core_type = #tpu.core_type<tc>, window_params = [{pipeline_mode = #tpu.pipeline_mode<synchronous>, transform_indices = @transform_0, window_bounds = array<i64: 8, 128>}, {transform_indices = @transform_1, window_bounds = array<i64: 8, 128>}]} {
    %c0 = arith.constant 0 : index
    %c0_0 = arith.constant 0 : index
    %0 = vector.load %arg1[%c0, %c0_0] : memref<8x128xf32, #tpu.memory_space<vmem>>, vector<8x128xf32>
    %cst = arith.constant 1.000000e+00 : f32
    %1 = vector.broadcast %cst : f32 to vector<8x128xf32>
    %2 = arith.addf %0, %1 : vector<8x128xf32>
    %c0_1 = arith.constant 0 : index
    %c0_2 = arith.constant 0 : index
    %3 = vector.load %arg2[%c0_1, %c0_2] : memref<8x128xf32, #tpu.memory_space<vmem>>, vector<8x128xf32>
    tpu.vector_store %arg2[%c0_1, %c0_2], %2 {strides = array<i32>} : memref<8x128xf32, #tpu.memory_space<vmem>>, vector<8x128xf32>,
    return
  }
  func.func @transform_0(%arg0: i32) -> (i32, i32) {
    %c0_i32 = arith.constant 0 : i32
    %c0_i32_0 = arith.constant 0 : i32
    %c0_i32_1 = arith.constant 0 : i32
    return %c0_i32, %c0_i32_0 : i32, i32
  }
  func.func @transform_1(%arg0: i32) -> (i32, i32) {
    %c0_i32 = arith.constant 0 : i32
    %c0_i32_0 = arith.constant 0 : i32
    return %arg0, %c0_i32 : i32, i32
  }
}

module attributes {stable_mosaic.version = 11 : i64} {
  func.func @kernel(%arg0: i32, %arg1: memref<8x16xf32, #tpu.memory_space<vmem>>, %arg2: memref<16x256xf32, #tpu.memory_space<vmem>>, %arg3: memref<1x256xf32, #tpu.memory_space<vmem>>, %arg4: memref<256x128xf32, #tpu.memory_space<vmem>>, %arg5: memref<1x128xf32, #tpu.memory_space<vmem>>, %arg6: memref<128x128xf32, #tpu.memory_space<vmem>>, %arg7: memref<1x128xf32, #tpu.memory_space<vmem>>, %arg8: memref<128x128xf32, #tpu.memory_space<vmem>>, %arg9: memref<1x128xf32, #tpu.memory_space<vmem>>, %arg10: memref<8x4xf32, #tpu.memory_space<vmem>>) attributes {dimension_semantics = [#tpu.dimension_semantics<parallel>], iteration_bounds = array<i64: 1>, scalar_prefetch = 0 : i64, scratch_operands = 0 : i64, tpu.core_type = #tpu.core_type<tc>, window_params = [{transform_indices = @transform_0, window_bounds = array<i64: 8, 16>}, {pipeline_mode = #tpu.pipeline_mode<synchronous>, transform_indices = @transform_1, window_bounds = array<i64: 16, 256>}, {pipeline_mode = #tpu.pipeline_mode<synchronous>, transform_indices = @transform_2, window_bounds = array<i64: 1, 256>}, {pipeline_mode = #tpu.pipeline_mode<synchronous>, transform_indices = @transform_3, window_bounds = array<i64: 256, 128>}, {pipeline_mode = #tpu.pipeline_mode<synchronous>, transform_indices = @transform_4, window_bounds = array<i64: 1, 128>}, {pipeline_mode = #tpu.pipeline_mode<synchronous>, transform_indices = @transform_5, window_bounds = array<i64: 128, 128>}, {pipeline_mode = #tpu.pipeline_mode<synchronous>, transform_indices = @transform_6, window_bounds = array<i64: 1, 128>}, {pipeline_mode = #tpu.pipeline_mode<synchronous>, transform_indices = @transform_7, window_bounds = array<i64: 128, 128>}, {pipeline_mode = #tpu.pipeline_mode<synchronous>, transform_indices = @transform_8, window_bounds = array<i64: 1, 128>}, {transform_indices = @transform_9, window_bounds = array<i64: 8, 4>}]} {
    %c0 = arith.constant 0 : index
    %c0_0 = arith.constant 0 : index
    %0 = vector.load %arg1[%c0, %c0_0] : memref<8x16xf32, #tpu.memory_space<vmem>>, vector<8x16xf32>
    %c0_1 = arith.constant 0 : index
    %c0_2 = arith.constant 0 : index
    %1 = vector.load %arg2[%c0_1, %c0_2] : memref<16x256xf32, #tpu.memory_space<vmem>>, vector<16x256xf32>
    %cst = arith.constant dense<0.000000e+00> : vector<8x256xf32>
    %2 = tpu.matmul %0, %1, %cst {dimension_numbers = #tpu.dot_dimension_numbers<[1], [0], [0], [1], [0, 0, 1, 1], [], []>} : vector<8x16xf32>, vector<16x256xf32>, vector<8x256xf32> -> vector<8x256xf32>
    %c0_3 = arith.constant 0 : index
    %c0_4 = arith.constant 0 : index
    %3 = vector.load %arg3[%c0_3, %c0_4] : memref<1x256xf32, #tpu.memory_space<vmem>>, vector<1x256xf32>
    %4 = vector.broadcast %3 : vector<1x256xf32> to vector<8x256xf32>
    %5 = arith.addf %2, %4 : vector<8x256xf32>
    %cst_5 = arith.constant 0.000000e+00 : f32
    %6 = vector.broadcast %cst_5 : f32 to vector<8x256xf32>
    %7 = arith.maximumf %5, %6 : vector<8x256xf32>
    %c0_6 = arith.constant 0 : index
    %c0_7 = arith.constant 0 : index
    %8 = vector.load %arg4[%c0_6, %c0_7] : memref<256x128xf32, #tpu.memory_space<vmem>>, vector<256x128xf32>
    %cst_8 = arith.constant dense<0.000000e+00> : vector<8x128xf32>
    %9 = tpu.matmul %7, %8, %cst_8 {dimension_numbers = #tpu.dot_dimension_numbers<[1], [0], [0], [1], [0, 0, 1, 1], [], []>} : vector<8x256xf32>, vector<256x128xf32>, vector<8x128xf32> -> vector<8x128xf32>
    %c0_9 = arith.constant 0 : index
    %c0_10 = arith.constant 0 : index
    %10 = vector.load %arg5[%c0_9, %c0_10] : memref<1x128xf32, #tpu.memory_space<vmem>>, vector<1x128xf32>
    %11 = vector.broadcast %10 : vector<1x128xf32> to vector<8x128xf32>
    %12 = arith.addf %9, %11 : vector<8x128xf32>
    %cst_11 = arith.constant 0.000000e+00 : f32
    %13 = vector.broadcast %cst_11 : f32 to vector<8x128xf32>
    %14 = arith.maximumf %12, %13 : vector<8x128xf32>
    %c0_12 = arith.constant 0 : index
    %c0_13 = arith.constant 0 : index
    %15 = vector.load %arg6[%c0_12, %c0_13] : memref<128x128xf32, #tpu.memory_space<vmem>>, vector<128x128xf32>
    %cst_14 = arith.constant dense<0.000000e+00> : vector<8x128xf32>
    %16 = tpu.matmul %14, %15, %cst_14 {dimension_numbers = #tpu.dot_dimension_numbers<[1], [0], [0], [1], [0, 0, 1, 1], [], []>} : vector<8x128xf32>, vector<128x128xf32>, vector<8x128xf32> -> vector<8x128xf32>
    %c0_15 = arith.constant 0 : index
    %c0_16 = arith.constant 0 : index
    %17 = vector.load %arg7[%c0_15, %c0_16] : memref<1x128xf32, #tpu.memory_space<vmem>>, vector<1x128xf32>
    %18 = vector.broadcast %17 : vector<1x128xf32> to vector<8x128xf32>
    %19 = arith.addf %16, %18 : vector<8x128xf32>
    %cst_17 = arith.constant 0.000000e+00 : f32
    %20 = vector.broadcast %cst_17 : f32 to vector<8x128xf32>
    %21 = arith.maximumf %19, %20 : vector<8x128xf32>
    %c0_18 = arith.constant 0 : index
    %c0_19 = arith.constant 0 : index
    %22 = vector.load %arg8[%c0_18, %c0_19] : memref<128x128xf32, #tpu.memory_space<vmem>>, vector<128x128xf32>
    %cst_20 = arith.constant dense<0.000000e+00> : vector<8x128xf32>
    %23 = tpu.matmul %21, %22, %cst_20 {dimension_numbers = #tpu.dot_dimension_numbers<[1], [0], [0], [1], [0, 0, 1, 1], [], []>} : vector<8x128xf32>, vector<128x128xf32>, vector<8x128xf32> -> vector<8x128xf32>
    %c0_21 = arith.constant 0 : index
    %c0_22 = arith.constant 0 : index
    %24 = vector.load %arg9[%c0_21, %c0_22] : memref<1x128xf32, #tpu.memory_space<vmem>>, vector<1x128xf32>
    %25 = vector.broadcast %24 : vector<1x128xf32> to vector<8x128xf32>
    %26 = arith.addf %23, %25 : vector<8x128xf32>
    %27 = vector.extract_strided_slice %26 {offsets = [0, 0], sizes = [8, 4], strides = [1, 1]} : vector<8x128xf32> to vector<8x4xf32>
    %c0_23 = arith.constant 0 : index
    %c0_24 = arith.constant 0 : index
    %28 = vector.load %arg10[%c0_23, %c0_24] : memref<8x4xf32, #tpu.memory_space<vmem>>, vector<8x4xf32>
    tpu.vector_store %arg10[%c0_23, %c0_24], %27 {strides = array<i32>} : memref<8x4xf32, #tpu.memory_space<vmem>>, vector<8x4xf32>,
    return
  }
  func.func @transform_0(%arg0: i32) -> (i32, i32) {
    %c0_i32 = arith.constant 0 : i32
    %c0_i32_0 = arith.constant 0 : i32
    return %arg0, %c0_i32 : i32, i32
  }
  func.func @transform_1(%arg0: i32) -> (i32, i32) {
    %c0_i32 = arith.constant 0 : i32
    %c0_i32_0 = arith.constant 0 : i32
    %c0_i32_1 = arith.constant 0 : i32
    return %c0_i32, %c0_i32_0 : i32, i32
  }
  func.func @transform_2(%arg0: i32) -> (i32, i32) {
    %c0_i32 = arith.constant 0 : i32
    %c0_i32_0 = arith.constant 0 : i32
    %c0_i32_1 = arith.constant 0 : i32
    return %c0_i32, %c0_i32_0 : i32, i32
  }
  func.func @transform_3(%arg0: i32) -> (i32, i32) {
    %c0_i32 = arith.constant 0 : i32
    %c0_i32_0 = arith.constant 0 : i32
    %c0_i32_1 = arith.constant 0 : i32
    return %c0_i32, %c0_i32_0 : i32, i32
  }
  func.func @transform_4(%arg0: i32) -> (i32, i32) {
    %c0_i32 = arith.constant 0 : i32
    %c0_i32_0 = arith.constant 0 : i32
    %c0_i32_1 = arith.constant 0 : i32
    return %c0_i32, %c0_i32_0 : i32, i32
  }
  func.func @transform_5(%arg0: i32) -> (i32, i32) {
    %c0_i32 = arith.constant 0 : i32
    %c0_i32_0 = arith.constant 0 : i32
    %c0_i32_1 = arith.constant 0 : i32
    return %c0_i32, %c0_i32_0 : i32, i32
  }
  func.func @transform_6(%arg0: i32) -> (i32, i32) {
    %c0_i32 = arith.constant 0 : i32
    %c0_i32_0 = arith.constant 0 : i32
    %c0_i32_1 = arith.constant 0 : i32
    return %c0_i32, %c0_i32_0 : i32, i32
  }
  func.func @transform_7(%arg0: i32) -> (i32, i32) {
    %c0_i32 = arith.constant 0 : i32
    %c0_i32_0 = arith.constant 0 : i32
    %c0_i32_1 = arith.constant 0 : i32
    return %c0_i32, %c0_i32_0 : i32, i32
  }
  func.func @transform_8(%arg0: i32) -> (i32, i32) {
    %c0_i32 = arith.constant 0 : i32
    %c0_i32_0 = arith.constant 0 : i32
    %c0_i32_1 = arith.constant 0 : i32
    return %c0_i32, %c0_i32_0 : i32, i32
  }
  func.func @transform_9(%arg0: i32) -> (i32, i32) {
    %c0_i32 = arith.constant 0 : i32
    %c0_i32_0 = arith.constant 0 : i32
    return %arg0, %c0_i32 : i32, i32
  }
}

</mosaic_0001>

<bundles_post_ra>
// kernel: tpu_custom_call.1
= control target key start
LH: loop header
LB: loop body
LE: loop exit
PB: predicated region body
PF: predicated region fallthrough
CT: control target
= control target key end

     0   :  { %6 = vsyncpa [#allocation3], 0  ;;  %s482_s0 = inlined_call_operand.hbm [shape: f32[8,128], index: 0, kind: input, shape index: {}]   ;;  %s483_s1 = inlined_call_operand.hbm [shape: f32[16,128], index: 1, kind: output, shape index: {}]  }
   0x1   :  { %7 = vsyncpa [#allocation4], 0 }
   0x2   :  { %9 = vsyncpa [#allocation4 + $0x1], 0  ;;  %s352_s6 = smov 0   ;;  %s354_s7 = smov 0  }
   0x3   :  { %s356_s8 = smov 0   ;;  %s358_s9 = smov 0  }
   0x4 LB: > { %s373_s10 = sadd.s32 4294967295, %s338_s9   ;;  %s184_s11 = sadd.s32 4294967294, %s338_s9   ;;  %s338_s9 = sphi %s358_s9, %s499_s9   ;;  %s334_s8 = sphi %s356_s8, %s498_s8   ;;  %s330_s7 = sphi %s354_s7, %s497_s7   ;;  %s326_s6 = sphi %s352_s6, %s496_s6  }
   0x5   : > { %s377_s12 = sadd.s32 1, %s338_s9   ;;  %s43_s13 = sadd.s32 1, %s334_s8 }
   0x6   : > { %s40_s14 = ssub.s32 %s338_s9, %s377_s12  ;;  %p53_p0 = scmp.ne.s32.totalorder %s334_s8, %s330_s7 }
   0x7   : > { %p41_p1 = scmp.eq.s32.totalorder %s40_s14, 0  ;;  %p54_p2 = scmp.eq.s32.totalorder %s373_s10, 1 }
   0x8   : > { %p59_p3 = scmp.ne.s32.totalorder %s330_s7, %s326_s6  ;;  %p60_p4 = scmp.eq.s32.totalorder %s184_s11, 1 }
   0x9   : > { %s388_s15 = scalar_select %p41_p1, %s334_s8, %s43_s13  }
   0xa   : > { %p390_p5 = por %p54_p2, %p53_p0  ;;  %p394_p6 = por %p60_p4, %p59_p3 }
   0xb   : > { %p185_p7 = scmp.ge.s32.totalorder %s338_s9, 1  ;;  %p67_p8 = scmp.lt.s32.totalorder %s338_s9, 3 }
   0xc   : > { %s487_s16 = scalar_select %p390_p5, 1, 0 }
   0xd   : > { %s488_s17 = scalar_select %p394_p6, 1, 0 }
   0xe   : > { %p484_p9 = scmp.eq.s32.totalorder %s373_s10, 0  ;;  %p401_p10 = pnand %p185_p7, %p67_p8 }
   0xf   : > { %s340_s19 = smov [#allocation2]   ;;  %s244_s24 = scalar_lea.hbm %s482_s0, 128 }
  0x10   : > { %s489_s18 = scalar_select %p401_p10, 1, 0 }
  0x11   : > { %s80_s20 = sshll.u32 %s340_s19, 4  ;;  %p200_p11 = pneg %p401_p10  ;;  %s81_s20 = int_to_ptr.vmem [resolvable:$true] %s80_s20 }
  0x12   : > { %p245_p13 = scmp.ne.s32.totalorder %s482_s0, %s244_s24  ;;  %p251_p3 = scmp.lt.u32.totalorder %s244_s24, %s482_s0 }
  0x13   : > { %p409_p12 = pnand %p484_p9, %p200_p11 }
  0x15   : > { %p246_p0 = pneg %p409_p12 }
  0x17   : > { %p247_p1 = pnand %p246_p0, %p245_p13 }
  0x19   : > { %p248_p2 = pneg %p247_p1 }
  0x1b   : > { %p253_p4 = pnand %p251_p3, %p248_p2 }
  0x1d   : > { %256 = shalt.err (!%p253_p4)
}
  0x1e   : > { %s257_s29 = scalar_lea.vmem %s81_s20, 128  ;;  %p265_p9 = scmp.lt.s32.totalorder %s81_s20, %s81_s20 }
  0x1f   : > { %p258_p7 = scmp.ne.s32.totalorder %s81_s20, %s257_s29  ;;  %p266_p6 = scmp.lt.s32.totalorder %s257_s29, %s257_s29 }
  0x21   : > { %p260_p8 = pnand %p258_p7, %p246_p0  ;;  %p267_p5 = por %p266_p6, %p265_p9 }
  0x23   : > { %p261_p11 = pneg %p260_p8 }
  0x25   : > { %p268_p10 = pnand %p267_p5, %p261_p11 }
  0x27   : > { %271 = shalt.err (!%p268_p10)
}
  0x28   : > { %203 = dma.hbm_to_vmem [thread:$0]  (!%p409_p12), %s482_s0, 128, %s81_s20, [#allocation3]  }
  0x29   : > { %p491_p13 = scmp.ne.s32.totalorder %s489_s18, 0 }
  0x2a   : > { %p492_p1 = scmp.eq.s32.totalorder (!%p491_p13), %s373_s10, 0 }
  0x2b   : > { %93 = sbr.rel (%p491_p13) target bundleno = 77 (0x4d), region = 24 }
  0x32   : > { %317 = dma.done.wait (%p492_p1), [#allocation3], 128   ;;  %p493_p0 = pmov %p492_p1 }
  0x33   : > { %s105_s3 = sand.u32 1, %s330_s7   ;;  %s191_s13 = sshll.u32 %s373_s10, 7  ;;  %v108_v0 = vld [vmem:[#allocation2] sm:$0xff] }
  0x34   : > { %319 = vsyncadd (%p493_p0), [#allocation3], 4294967168  ;;  %s189_s4 = sshll.u32 %s105_s3, 3  ;;  %v109_v1 = vadd.f32 1.0, %v108_v0  ;;  %s442_s19 = scalar_lea.hbm %s483_s1, %s191_s13 }
  0x35   : > { %s107_s5 = scalar_lea.vmem [#allocation5], %s189_s4  ;;  %s112_s20 = scalar_lea.sflag [#allocation4], %s105_s3 }
  0x36   : > { %s125_s11 = sshll.u32 %s107_s5, 4  ;;  %110 = vst [vmem:[%s107_s5] sm:$0xff] %v109_v1  ;;  %p494_p6 = scmp.ne.s32.totalorder %s487_s16, 0  ;;  %s437_s11 = int_to_ptr.vmem [resolvable:$true] %s125_s11 }
  0x37   : > { %s272_s21 = scalar_lea.vmem %s437_s11, 128  ;;  %s341_s10 = smov [#allocation5]  }
  0x38   : > { %p273_p5 = scmp.ne.s32.totalorder %s437_s11, %s272_s21  ;;  %s276_s22 = sshll.u32 %s341_s10, 4  ;;  %s277_s22 = int_to_ptr.vmem [resolvable:$false] %s276_s22 }
  0x39   : > { %s278_s23 = scalar_lea.vmem %s277_s22, 256  ;;  %p279_p12 = scmp.lt.s32.totalorder %s437_s11, %s277_s22 }
  0x3a   : > { %p274_p9 = pnand %p273_p5, %p494_p6  ;;  %p280_p2 = scmp.lt.s32.totalorder %s278_s23, %s272_s21 }
  0x3c   : > { %p275_p10 = pneg %p274_p9  ;;  %p281_p3 = por %p280_p2, %p279_p12 }
  0x3e   : > { %p282_p4 = pnand %p281_p3, %p275_p10 }
  0x40   : > { %285 = shalt.err (!%p282_p4)
}
  0x41   : > { %s286_s24 = scalar_lea.hbm %s442_s19, 128  ;;  %s290_s27 = scalar_lea.hbm %s483_s1, 256 }
  0x42   : > { %p287_p7 = scmp.ne.s32.totalorder %s442_s19, %s286_s24  ;;  %p291_p13 = scmp.lt.u32.totalorder %s442_s19, %s483_s1 }
  0x43   : > { %p292_p1 = scmp.lt.u32.totalorder %s290_s27, %s286_s24  ;;  %p294_p5 = scmp.lt.u32.totalorder %s286_s24, %s442_s19 }
  0x44   : > { %p288_p8 = pnand %p287_p7, %p494_p6 }
  0x45   : > { %p293_p0 = por %p292_p1, %p291_p13 }
  0x46   : > { %p289_p11 = pneg %p288_p8 }
  0x47   : > { %p295_p9 = por %p294_p5, %p293_p0 }
  0x49   : > { %p296_p10 = pnand %p295_p9, %p289_p11 }
  0x4b   : > { %299 = shalt.err (!%p296_p10)
}
  0x4c   : > { %198 = dma.vmem_to_hbm [thread:$0]  (%p494_p6), %s437_s11, 128, %s442_s19, %s112_s20  }
  0x4d PF: > { %p210_p12 = scmp.ge.s32.totalorder %s338_s9, 2  ;;  %s137_s30 = sand.u32 1, %s326_s6  }
  0x4e   : > { %p495_p2 = scmp.ne.s32.totalorder %s488_s17, 0  ;;  %s138_s2 = scalar_lea.sflag [#allocation4], %s137_s30 }
  0x50   : > { %p205_p3 = pnand %p210_p12, %p495_p2 }
  0x52   : > { %321 = dma.done.wait (!%p205_p3), %s138_s2, 128  }
  0x53   : > { %323 = vsyncadd (!%p205_p3), %s138_s2, 4294967168  ;;  %p12_p4 = scmp.ge.s32.totalorder %s377_s12, 4   ;;  %s496_s6 = smov %s330_s7 }
  0x54   : > { %s497_s7 = smov %s334_s8  ;;  %s498_s8 = smov %s388_s15 }
  0x55   : > { %s499_s9 = smov %s377_s12  ;;  %14 = sbr.rel (!%p12_p4) target bundleno = 4 (0x4), region = 61 }
  0x5c   :  { %143 = vsyncpa [#allocation3], 1 }
  0x5d   :  { %145 = vsyncpa [#allocation3 + $0x1], 1 }
  0x5e   :  { %146 = vsyncpa [#allocation4], 1 }
  0x5f   :  { %148 = vsyncpa [#allocation4 + $0x1], 1 }

// kernel: dqn_forward.1
= control target key start
LH: loop header
LB: loop body
LE: loop exit
PB: predicated region body
PF: predicated region fallthrough
CT: control target
= control target key end

     0   :  { %14 = vsyncpa [#allocation3], 0  ;;  %s1018_s0 = inlined_call_operand.hbm [shape: f32[8,16], index: 0, kind: input, shape index: {}]   ;;  %s1019_s1 = inlined_call_operand.hbm [shape: f32[16,256], index: 1, kind: input, shape index: {}]   ;;  %s1020_s2 = inlined_call_operand.vmem [shape: f32[1,256], index: 2, kind: input, shape index: {}]   ;;  %s1021_s3 = inlined_call_operand.hbm [shape: f32[256,128], index: 3, kind: input, shape index: {}]   ;;  %s1022_s4 = inlined_call_operand.vmem [shape: f32[1,128], index: 4, kind: input, shape index: {}]   ;;  %s1023_s5 = inlined_call_operand.hbm [shape: f32[128,128], index: 5, kind: input, shape index: {}]   ;;  %s1024_s6 = inlined_call_operand.vmem [shape: f32[1,128], index: 6, kind: input, shape index: {}]   ;;  %s1025_s7 = inlined_call_operand.hbm [shape: f32[128,128], index: 7, kind: input, shape index: {}]   ;;  %s1026_s8 = inlined_call_operand.vmem [shape: f32[1,128], index: 8, kind: input, shape index: {}]   ;;  %s1027_s9 = inlined_call_operand.vmem [shape: f32[8,4], index: 9, kind: output, shape index: {}]  }
   0x1   :  { %15 = vsyncpa [#allocation5], 0 }
   0x2   :  { %16 = vsyncpa [#allocation8], 0  ;;  %s853_s30 = smov [#allocation4]   ;;  %s737_s13 = scalar_lea.hbm %s1019_s1, 512 }
   0x3   :  { %s32_s10 = sshll.u32 %s853_s30, 4  ;;  %p738_p0 = scmp.ne.s32.totalorder %s1019_s1, %s737_s13  ;;  %s33_s10 = int_to_ptr.vmem [resolvable:$true] %s32_s10 }
   0x4   :  { %p741_p1 = scmp.lt.u32.totalorder %s737_s13, %s1019_s1 }
   0x6   :  { %p743_p2 = pnand %p741_p1, %p738_p0 }
   0x8   :  { %746 = shalt.err (!%p743_p2)
}
   0x9   :  { %s747_s18 = scalar_lea.vmem %s33_s10, 512  ;;  %p752_p4 = scmp.lt.s32.totalorder %s33_s10, %s33_s10 }
   0xa   :  { %p748_p3 = scmp.ne.s32.totalorder %s33_s10, %s747_s18  ;;  %p753_p5 = scmp.lt.s32.totalorder %s747_s18, %s747_s18 }
   0xc   :  { %p754_p6 = por %p753_p5, %p752_p4 }
   0xe   :  { %p755_p7 = pnand %p754_p6, %p748_p3 }
  0x10   :  { %758 = shalt.err (!%p755_p7)
}
  0x11   :  { %s854_s19 = smov 256   ;;  %s855_s20 = smov 16  }
  0x12   :  { %38 = dma.hbm_to_vmem [thread:$0]  %s1019_s1, 512, %s33_s10, [#allocation5], %s854_s19, %s854_s19, %s855_s20  }
  0x13   :  { %s856_s23 = smov [#allocation7]   ;;  %s857_s25 = smov [#allocation2]  }
  0x14   :  { %s60_s24 = sshll.u32 %s856_s23, 4  ;;  %s23_s26 = sshll.u32 %s857_s25, 4  ;;  %s61_s24 = int_to_ptr.vmem [resolvable:$true] %s60_s24  ;;  %s24_s26 = int_to_ptr.vmem [resolvable:$true] %s23_s26 }
  0x15   :  { %s759_s29 = scalar_lea.hbm %s1023_s5, 2048 }
  0x16   :  { %p760_p8 = scmp.ne.s32.totalorder %s1023_s5, %s759_s29  ;;  %p763_p9 = scmp.lt.u32.totalorder %s759_s29, %s1023_s5 }
  0x18   :  { %p765_p10 = pnand %p763_p9, %p760_p8 }
  0x1a   :  { %768 = shalt.err (!%p765_p10)
}
  0x1b   :  { %s769_s1 = scalar_lea.vmem %s61_s24, 2048  ;;  %p774_p12 = scmp.lt.s32.totalorder %s61_s24, %s61_s24 }
  0x1c   :  { %p770_p11 = scmp.ne.s32.totalorder %s61_s24, %s769_s1  ;;  %p775_p13 = scmp.lt.s32.totalorder %s769_s1, %s769_s1 }
  0x1e   :  { %p776_p0 = por %p775_p13, %p774_p12 }
  0x20   :  { %p777_p1 = pnand %p776_p0, %p770_p11 }
  0x22   :  { %780 = shalt.err (!%p777_p1)
}
  0x23   :  { %s858_s10 = smov 128   ;;  %s859_s14 = smov 8  }
  0x24   :  { %66 = dma.hbm_to_vmem [thread:$0]  %s1023_s5, 2048, %s61_s24, [#allocation8], %s858_s10, %s858_s10, %s859_s14  }
  0x25   :  { %s781_s19 = scalar_lea.hbm %s1018_s0, 128 }
  0x26   :  { %p782_p2 = scmp.ne.s32.totalorder %s1018_s0, %s781_s19  ;;  %p785_p3 = scmp.lt.u32.totalorder %s781_s19, %s1018_s0 }
  0x28   :  { %p787_p4 = pnand %p785_p3, %p782_p2 }
  0x2a   :  { %790 = shalt.err (!%p787_p4)
}
  0x2b   :  { %s791_s25 = scalar_lea.vmem %s24_s26, 128  ;;  %p796_p6 = scmp.lt.s32.totalorder %s24_s26, %s24_s26 }
  0x2c   :  { %p792_p5 = scmp.ne.s32.totalorder %s24_s26, %s791_s25  ;;  %p797_p7 = scmp.lt.s32.totalorder %s791_s25, %s791_s25 }
  0x2e   :  { %p798_p8 = por %p797_p7, %p796_p6 }
  0x30   :  { %p799_p9 = pnand %p798_p8, %p792_p5 }
  0x32   :  { %802 = shalt.err (!%p799_p9)
}
  0x33   :  { %26 = dma.hbm_to_vmem [thread:$0]  %s1018_s0, 128, %s24_s26, [#allocation3]  }
  0x34   :  { %s860_s27 = smov [#allocation6]   ;;  %s861_s29 = smov [#allocation9]  }
  0x35   :  { %s46_s28 = sshll.u32 %s860_s27, 4  ;;  %s74_s30 = sshll.u32 %s861_s29, 4  ;;  %s47_s28 = int_to_ptr.vmem [resolvable:$true] %s46_s28  ;;  %s75_s30 = int_to_ptr.vmem [resolvable:$true] %s74_s30 }
  0x36   :  { %s803_s13 = scalar_lea.hbm %s1021_s3, 4096 }
  0x37   :  { %p804_p10 = scmp.ne.s32.totalorder %s1021_s3, %s803_s13  ;;  %p807_p11 = scmp.lt.u32.totalorder %s803_s13, %s1021_s3 }
  0x39   :  { %p809_p12 = pnand %p807_p11, %p804_p10 }
  0x3b   :  { %812 = shalt.err (!%p809_p12)
}
  0x3c   :  { %s813_s0 = scalar_lea.vmem %s47_s28, 4096  ;;  %p818_p0 = scmp.lt.s32.totalorder %s47_s28, %s47_s28 }
  0x3d   :  { %p814_p13 = scmp.ne.s32.totalorder %s47_s28, %s813_s0  ;;  %p819_p1 = scmp.lt.s32.totalorder %s813_s0, %s813_s0 }
  0x3f   :  { %p820_p2 = por %p819_p1, %p818_p0 }
  0x41   :  { %p821_p3 = pnand %p820_p2, %p814_p13 }
  0x43   :  { %824 = shalt.err (!%p821_p3)
}
  0x44   :  { %52 = dma.hbm_to_vmem [thread:$0]  %s1021_s3, 4096, %s47_s28, [#allocation5], %s858_s10, %s858_s10, %s859_s14  }
  0x45   :  { %s825_s21 = scalar_lea.hbm %s1025_s7, 2048 }
  0x46   :  { %p826_p4 = scmp.ne.s32.totalorder %s1025_s7, %s825_s21  ;;  %p829_p5 = scmp.lt.u32.totalorder %s825_s21, %s1025_s7 }
  0x48   :  { %p831_p6 = pnand %p829_p5, %p826_p4 }
  0x4a   :  { %834 = shalt.err (!%p831_p6)
}
  0x4b   :  { %s835_s24 = scalar_lea.vmem %s75_s30, 2048  ;;  %p840_p8 = scmp.lt.s32.totalorder %s75_s30, %s75_s30 }
  0x4c   :  { %p836_p7 = scmp.ne.s32.totalorder %s75_s30, %s835_s24  ;;  %p841_p9 = scmp.lt.s32.totalorder %s835_s24, %s835_s24 }
  0x4e   :  { %p842_p10 = por %p841_p9, %p840_p8 }
  0x50   :  { %p843_p11 = pnand %p842_p10, %p836_p7 }
  0x52   :  { %846 = shalt.err (!%p843_p11)
}
  0x53   :  { %80 = dma.hbm_to_vmem [thread:$0]  %s1025_s7, 2048, %s75_s30, [#allocation8], %s858_s10, %s858_s10, %s859_s14  }
  0x54   :  { %847 = dma.done.wait [#allocation3], 128  }
  0x55   :  { %848 = vsyncadd [#allocation3], 4294967168 }
  0x56   :  { %849 = dma.done.wait [#allocation5], 4608  }
  0x57   :  { %850 = vsyncadd [#allocation5], 4294962688 }
  0x58   :  { %851 = dma.done.wait [#allocation8], 4096  }
  0x59   :  { %852 = vsyncadd [#allocation8], 4294963200  ;;  %v862_v0 = vmov 0.0   ;;  %v100_v1 = vld [vmem:[#allocation4 + $0x8] sm:$0xff]  ;;  %v102_v2 = vld [vmem:[#allocation4 + $0x18] sm:$0xff]  ;;  %vm115_vm0 = vcmask 130048  }
  0x5a   :  { %183 = vmatprep.mubr.f32.mxu0 %v862_v0  ;;  %v99_v3 = vld [vmem:[#allocation4] sm:$0xff]  ;;  %v641_v4 = vpack.c.bf16 %v102_v2, %v100_v1  ;;  %v101_v5 = vld [vmem:[#allocation4 + $0x10] sm:$0xff]  ;;  %v98_v8 = vld [vmem:[#allocation2] sm:$0xff]  ;;  %v863_v59 = vmov 0.0|0.0   ;;  %vm864_vm1 = vmmov 0   ;;  %vm489_vm2 = vcmask 31744  }
  0x5b   :  { %v208_v6 = vld [vmem:[#allocation6 + $0x80] sm:$0xff]  ;;  %v643_v7 = vpack.c.bf16 %v101_v5, %v99_v3  ;;  %v209_v9 = vld [vmem:[#allocation6 + $0x88] sm:$0xff]  ;;  %v210_v14 = vld [vmem:[#allocation6 + $0x90] sm:$0xff] }
  0x5c   :  { %v192_v10 = vld [vmem:[#allocation6] sm:$0xff]  ;;  %v193_v11 = vld [vmem:[#allocation6 + $0x8] sm:$0xff]  ;;  %642 = vmatprep.subr.bf16.mxu0 %v641_v4  ;;  %v645_v12 = vpack.c.bf16 %v209_v9, %v208_v6  ;;  %v211_v15 = vld [vmem:[#allocation6 + $0x98] sm:$0xff] }
  0x5d   :  { %v647_v13 = vpack.c.bf16 %v193_v11, %v192_v10  ;;  %v194_v16 = vld [vmem:[#allocation6 + $0x10] sm:$0xff]  ;;  %644 = vmatpush1.bf16.msra.mxu0 %v643_v7  ;;  %v649_v17 = vpack.c.bf16 %v211_v15, %v210_v14  ;;  %v195_v18 = vld [vmem:[#allocation6 + $0x18] sm:$0xff]  ;;  %v212_v19 = vld [vmem:[#allocation6 + $0xa0] sm:$0xff] }
  0x5e   :  { %v213_v20 = vld [vmem:[#allocation6 + $0xa8] sm:$0xff]  ;;  %646 = vmatprep.subr.bf16.mxu1 %v645_v12  ;;  %v651_v21 = vpack.c.bf16 %v195_v18, %v194_v16  ;;  %v196_v23 = vld [vmem:[#allocation6 + $0x20] sm:$0xff]  ;;  %v214_v25 = vld [vmem:[#allocation6 + $0xb0] sm:$0xff]  ;;  %677 = vmatprep.subr.bf16.mxu0 %v863_v59  ;;  %v105_v12 = vlaneseq }
  0x5f   :  { %648 = vmatpush3.bf16.msra.mxu1 %v647_v13  ;;  %v653_v22 = vpack.c.bf16 %v213_v20, %v212_v19  ;;  %v197_v24 = vld [vmem:[#allocation6 + $0x28] sm:$0xff]  ;;  %v215_v26 = vld [vmem:[#allocation6 + $0xb8] sm:$0xff]  ;;  %v198_v29 = vld [vmem:[#allocation6 + $0x30] sm:$0xff] }
  0x60   :  { %498 = vmatmul.mubr.msk.f32.vlgmr.msra.gmra.mrb[0].mxu0 %vm115_vm0, %v98_v8  ;;  %650 = vmatprep.subr.bf16.mxu1 %v649_v17  ;;  %v655_v27 = vpack.c.bf16 %v197_v24, %v196_v23  ;;  %v657_v28 = vpack.c.bf16 %v215_v26, %v214_v25  ;;  %v199_v30 = vld [vmem:[#allocation6 + $0x38] sm:$0xff]  ;;  %v216_v31 = vld [vmem:[#allocation6 + $0xc0] sm:$0xff]  ;;  %v217_v32 = vld [vmem:[#allocation6 + $0xc8] sm:$0xff]  ;;  %v106_v13 = vshrl.u32 %v105_v12, 7 }
  0x61   :  { %v659_v33 = vpack.c.bf16 %v199_v30, %v198_v29  ;;  %v661_v34 = vpack.c.bf16 %v217_v32, %v216_v31  ;;  %v200_v35 = vld [vmem:[#allocation6 + $0x40] sm:$0xff]  ;;  %v201_v36 = vld [vmem:[#allocation6 + $0x48] sm:$0xff]  ;;  %v218_v37 = vld [vmem:[#allocation6 + $0xd0] sm:$0xff]  ;;  %603 = vmatprep.mubr.msk.f32.mxu0 %vm864_vm1, %v862_v0 }
  0x62   :  { %v219_v38 = vld [vmem:[#allocation6 + $0xd8] sm:$0xff]  ;;  %v663_v39 = vpack.c.bf16 %v201_v36, %v200_v35  ;;  %v202_v41 = vld [vmem:[#allocation6 + $0x50] sm:$0xff]  ;;  %v220_v43 = vld [vmem:[#allocation6 + $0xe0] sm:$0xff]  ;;  %v107_v14 = vsub.s32 0, %v106_v13  ;;  %v111_v16 = vsub.s32 1, %v106_v13 }
  0x63   :  { %652 = vmatpush3.bf16.msra.mxu1 %v651_v21  ;;  %v665_v40 = vpack.c.bf16 %v219_v38, %v218_v37  ;;  %v203_v42 = vld [vmem:[#allocation6 + $0x58] sm:$0xff]  ;;  %v221_v44 = vld [vmem:[#allocation6 + $0xe8] sm:$0xff]  ;;  %v204_v47 = vld [vmem:[#allocation6 + $0x60] sm:$0xff] }
  0x64   :  { %654 = vmatprep.subr.bf16.mxu1 %v653_v22  ;;  %v667_v45 = vpack.c.bf16 %v203_v42, %v202_v41  ;;  %v669_v46 = vpack.c.bf16 %v221_v44, %v220_v43  ;;  %v205_v48 = vld [vmem:[#allocation6 + $0x68] sm:$0xff]  ;;  %v222_v50 = vld [vmem:[#allocation6 + $0xf0] sm:$0xff]  ;;  %v223_v51 = vld [vmem:[#allocation6 + $0xf8] sm:$0xff] }
  0x65   :  { %v671_v49 = vpack.c.bf16 %v205_v48, %v204_v47  ;;  %v673_v52 = vpack.c.bf16 %v223_v51, %v222_v50  ;;  %v206_v53 = vld [vmem:[#allocation6 + $0x70] sm:$0xff]  ;;  %v207_v54 = vld [vmem:[#allocation6 + $0x78] sm:$0xff]  ;;  %v302_v56 = vld [vmem:[#allocation7] sm:$0xff] }
  0x66   :  { %v675_v55 = vpack.c.bf16 %v207_v54, %v206_v53  ;;  %v303_v57 = vld [vmem:[#allocation7 + $0x8] sm:$0xff]  ;;  %v304_v58 = vld [vmem:[#allocation7 + $0x10] sm:$0xff]  ;;  %v305_v61 = vld [vmem:[#allocation7 + $0x18] sm:$0xff] }
  0x67   :  { %656 = vmatpush3.bf16.msra.mxu1 %v655_v27  ;;  %v678_v60 = vpack.c.bf16 %v303_v57, %v302_v56  ;;  %v681_v62 = vpack.c.bf16 %v305_v61, %v304_v58  ;;  %v306_v63 = vld [vmem:[#allocation7 + $0x20] sm:$0xff]  ;;  %v307_v1 = vld [vmem:[#allocation7 + $0x28] sm:$0xff]  ;;  %v308_v3 = vld [vmem:[#allocation7 + $0x30] sm:$0xff] }
  0x68   :  { %658 = vmatprep.subr.bf16.mxu1 %v657_v28  ;;  %v684_v2 = vpack.c.bf16 %v307_v1, %v306_v63  ;;  %v309_v4 = vld [vmem:[#allocation7 + $0x38] sm:$0xff]  ;;  %v310_v6 = vld [vmem:[#allocation7 + $0x40] sm:$0xff]  ;;  %v311_v7 = vld [vmem:[#allocation7 + $0x48] sm:$0xff] }
  0x69   :  { %679 = vmatpush3.bf16.msra.mxu0 %v678_v60  ;;  %v687_v5 = vpack.c.bf16 %v309_v4, %v308_v3  ;;  %v690_v8 = vpack.c.bf16 %v311_v7, %v310_v6  ;;  %v312_v9 = vld [vmem:[#allocation7 + $0x50] sm:$0xff]  ;;  %v313_v10 = vld [vmem:[#allocation7 + $0x58] sm:$0xff]  ;;  %v314_v25 = vld [vmem:[#allocation7 + $0x60] sm:$0xff] }
  0x6a   :  { %680 = vmatprep.subr.bf16.mxu0 %v863_v59  ;;  %v693_v11 = vpack.c.bf16 %v313_v10, %v312_v9  ;;  %v103_v15 = vld [vmem:[%s1020_s2] sm:$0x3]  ;;  %v315_v26 = vld [vmem:[#allocation7 + $0x68] sm:$0xff]  ;;  %v317_v29 = vld [vmem:[#allocation7 + $0x78] sm:$0xff] }
  0x6b   :  { %660 = vmatpush3.bf16.msra.mxu1 %v659_v33  ;;  %v108_v17 = vrot.slane %v103_v15, %v107_v14  ;;  %v112_v18 = vrot.slane %v103_v15, %v111_v16  ;;  %v696_v27 = vpack.c.bf16 %v315_v26, %v314_v25  ;;  %v316_v28 = vld [vmem:[#allocation7 + $0x70] sm:$0xff]  ;;  %v396_v31 = vld [vmem:[#allocation9] sm:$0xff]  ;;  %v397_v32 = vld [vmem:[#allocation9 + $0x8] sm:$0xff] }
  0x6c   :  { %662 = vmatprep.subr.bf16.mxu1 %v661_v34  ;;  %v699_v30 = vpack.c.bf16 %v317_v29, %v316_v28  ;;  %v398_v33 = vld [vmem:[#allocation9 + $0x10] sm:$0xff]  ;;  %v702_v34 = vpack.c.bf16 %v397_v32, %v396_v31  ;;  %v399_v35 = vld [vmem:[#allocation9 + $0x18] sm:$0xff]  ;;  %v400_v37 = vld [vmem:[#allocation9 + $0x20] sm:$0xff] }
  0x6d   :  { %682 = vmatpush3.bf16.msra.mxu0 %v681_v62  ;;  %v705_v36 = vpack.c.bf16 %v399_v35, %v398_v33  ;;  %v401_v38 = vld [vmem:[#allocation9 + $0x28] sm:$0xff]  ;;  %v403_v41 = vld [vmem:[#allocation9 + $0x38] sm:$0xff]  ;;  %v408_v48 = vld [vmem:[#allocation9 + $0x60] sm:$0xff] }
  0x6e   :  { %683 = vmatprep.subr.bf16.mxu0 %v863_v59  ;;  %v405_v43 = vld [vmem:[#allocation9 + $0x48] sm:$0xff]  ;;  %v410_v57 = vld [vmem:[#allocation9 + $0x70] sm:$0xff]  ;;  %v411_v58 = vld [vmem:[#allocation9 + $0x78] sm:$0xff] }
  0x6f   :  { %664 = vmatpush3.bf16.msra.mxu1 %v663_v39  ;;  %v708_v39 = vpack.c.bf16 %v401_v38, %v400_v37  ;;  %v723_v60 = vpack.c.bf16 %v411_v58, %v410_v57  ;;  %v500_v61 = vld [vmem:[%s1024_s6] ss:$0 sm:$0xff] }
  0x70   :  { %666 = vmatprep.subr.bf16.mxu1 %v665_v40  ;;  %v402_v40 = vld [vmem:[#allocation9 + $0x30] sm:$0xff] }
  0x71   :  { %685 = vmatpush3.bf16.msra.mxu0 %v684_v2  ;;  %v711_v42 = vpack.c.bf16 %v403_v41, %v402_v40  ;;  %v501_v2 = vld [vmem:[%s1026_s8] ss:$0 sm:$0xff] }
  0x72   :  { %686 = vmatprep.subr.bf16.mxu0 %v863_v59 }
  0x73   :  { %668 = vmatpush3.bf16.msra.mxu1 %v667_v45  ;;  %v406_v45 = vld [vmem:[#allocation9 + $0x50] sm:$0xff] }
  0x74   :  { %670 = vmatprep.subr.bf16.mxu1 %v669_v46  ;;  %v407_v46 = vld [vmem:[#allocation9 + $0x58] sm:$0xff] }
  0x75   :  { %688 = vmatpush3.bf16.msra.mxu0 %v687_v5  ;;  %v717_v47 = vpack.c.bf16 %v407_v46, %v406_v45 }
  0x76   :  { %689 = vmatprep.subr.bf16.mxu0 %v863_v59 }
  0x77   :  { %672 = vmatpush3.bf16.msra.mxu1 %v671_v49  ;;  %v409_v49 = vld [vmem:[#allocation9 + $0x68] sm:$0xff] }
  0x78   :  { %674 = vmatprep.subr.bf16.mxu1 %v673_v52  ;;  %v720_v50 = vpack.c.bf16 %v409_v49, %v408_v48  ;;  %v499_v52 = vld [vmem:[%s1022_s4] ss:$0 sm:$0xff] }
  0x79   :  { %691 = vmatpush3.bf16.msra.mxu0 %v690_v8 }
  0x7a   :  { %692 = vmatprep.subr.bf16.mxu0 %v863_v59 }
  0x7b   :  { %676 = vmatpush3.bf16.msra.mxu1 %v675_v55 }
  0x7c   :  { %701 = vmatprep.subr.bf16.mxu1 %v863_v59 }
  0x7d   :  { %694 = vmatpush3.bf16.msra.mxu0 %v693_v11 }
  0x7e   :  { %695 = vmatprep.subr.bf16.mxu0 %v863_v59 }
  0x81   :  { %697 = vmatpush3.bf16.msra.mxu0 %v696_v27 }
  0x82   :  { %698 = vmatprep.subr.bf16.mxu0 %v863_v59 }
  0x85   :  { %700 = vmatpush3.bf16.msra.mxu0 %v699_v30 }
 0x133   :  { %v185_v19 = vpop.f32.mrb[0].mxu0 }
 0x134   :  { %v186_v20 = vadd.f32 %v185_v19, %v108_v17  ;;  %v187_v21 = vpop.f32.mrb[1].mxu0 }
 0x135   :  { %v188_v22 = vadd.f32 %v187_v21, %v112_v18 }
 0x136   :  { %v190_v24 = vmax.f32 %v186_v20, 0.0 }
 0x137   :  { %v191_v23 = vmax.f32 %v188_v22, 0.0 }
 0x139   :  { %295 = vmatprep.mubr.f32.mxu1 %v191_v23 }
 0x13a   :  { %296 = vmatmul.mubr.f32.vlgmr.msra.gmra.mrb[0].mxu1 %v190_v24 }
 0x13b   :  { %638 = vmatprep.mubr.msk.f32.mxu1 %vm864_vm1, %v862_v0  ;;  %703 = vmatpush3.bf16.msra.mxu1 %v702_v34  ;;  %v404_v0 = vld [vmem:[#allocation9 + $0x40] sm:$0xff] }
 0x13c   :  { %704 = vmatprep.subr.bf16.mxu1 %v863_v59  ;;  %v714_v44 = vpack.c.bf16 %v405_v43, %v404_v0 }
 0x13f   :  { %706 = vmatpush3.bf16.msra.mxu1 %v705_v36 }
 0x140   :  { %707 = vmatprep.subr.bf16.mxu1 %v863_v59 }
 0x143   :  { %709 = vmatpush3.bf16.msra.mxu1 %v708_v39 }
 0x144   :  { %710 = vmatprep.subr.bf16.mxu1 %v863_v59 }
 0x147   :  { %712 = vmatpush3.bf16.msra.mxu1 %v711_v42 }
 0x148   :  { %713 = vmatprep.subr.bf16.mxu1 %v863_v59 }
 0x14b   :  { %715 = vmatpush3.bf16.msra.mxu1 %v714_v44 }
 0x14c   :  { %716 = vmatprep.subr.bf16.mxu1 %v863_v59 }
 0x14f   :  { %718 = vmatpush3.bf16.msra.mxu1 %v717_v47 }
 0x150   :  { %719 = vmatprep.subr.bf16.mxu1 %v863_v59 }
 0x153   :  { %721 = vmatpush3.bf16.msra.mxu1 %v720_v50 }
 0x154   :  { %722 = vmatprep.subr.bf16.mxu1 %v863_v59 }
 0x157   :  { %724 = vmatpush3.bf16.msra.mxu1 %v723_v60 }
 0x20d   :  { %v534_v51 = vpop.f32.mrb[0].mxu1 }
 0x20e   :  { %v535_v53 = vpop.f32.mrb[1].mxu1 }
 0x20f   :  { %v536_v54 = vadd.f32 %v535_v53, %v534_v51 }
 0x211   :  { %v298_v55 = vadd.f32 %v536_v54, %v499_v52 }
 0x213   :  { %v301_v56 = vmax.f32 %v298_v55, 0.0 }
 0x215   :  { %604 = vmatmul.mubr.f32.vlgmr.msra.gmra.mrb[2].mxu0 %v301_v56 }
 0x2e8   :  { %v391_v62 = vpop.f32.mrb[2].mxu0 }
 0x2e9   :  { %v392_v59 = vadd.f32 %v500_v61, %v391_v62  ;;  %v605_v63 = vpop.f32.mrb[3].mxu0 }
 0x2eb   :  { %v395_v1 = vmax.f32 %v392_v59, 0.0 }
 0x2ed   :  { %639 = vmatmul.mubr.f32.vlgmr.msra.gmra.mrb[2].mxu1 %v395_v1 }
 0x3c0   :  { %v485_v3 = vpop.f32.mrb[2].mxu1 }
 0x3c1   :  { %v486_v4 = vadd.f32 %v501_v2, %v485_v3  ;;  %v640_v5 = vpop.f32.mrb[3].mxu1 }
 0x3c3   :  { %490 = vst.msk [vmem:[%s1027_s9] sm:$0xff] %vm489_vm2, %v486_v4 }
 0x3c4   :  { %495 = vsyncpa [#allocation3], 1 }
 0x3c5   :  { %496 = vsyncpa [#allocation5], 1 }
 0x3c6   :  { %497 = vsyncpa [#allocation8], 1 }

</bundles_post_ra>
